<compile_context>
chip_gen: v5e
topology: v5e:2x2
jax: 0.10.0
libtpu: 0.0.40
codegen_flags: <defaults>
</compile_context>

<pallas_src>
import functools

import jax
import jax.numpy as jnp
from jax.experimental import pallas as pl
from jax.experimental.pallas import tpu as pltpu


# ----------------------------------------------------------------------------
# Hardware introspection (generation-aware VMEM budgets / TensorCore count).
# ----------------------------------------------------------------------------
def _tpu_topology():
    """(vmem_capacity_bytes, tensorcores_per_chip) with conservative fallbacks."""
    vmem_cap = 64 * 2**20          # conservative: v7x per-core VMEM
    num_tc = 1
    try:
        info = pltpu.get_tpu_info()
        vmem_cap = int(getattr(info, "vmem_capacity_bytes", vmem_cap))
        for attr in ("num_cores_per_chip", "tensor_cores_per_chip", "num_cores"):
            if hasattr(info, attr):
                num_tc = int(getattr(info, attr))
                break
    except Exception:
        pass
    try:
        if "7" in jax.devices()[0].device_kind.lower():   # v7x: 2 TCs per chip
            num_tc = max(num_tc, 2)
    except Exception:
        pass
    return vmem_cap, min(max(num_tc, 1), 2)


def _invariant_weight_spec_kwargs(weight_bytes):
    """Single-buffer large grid-invariant weights (constant block index).

    Only applied when the weights are big enough for the saved VMEM copy to
    matter; tiny weights keep the well-trodden default double-buffering.
    """
    if weight_bytes < (1 << 20):
        return {}
    try:
        mode = pl.Buffered(1)
        pl.BlockSpec((8, 128), lambda i: (0, 0), pipeline_mode=mode)  # API probe
        return {"pipeline_mode": mode}
    except Exception:
        return {}


def _per_lane_bytes(cin, cout, wa_rows, n_outs, x_itemsize, out_itemsize):
    """VMEM bytes per lane: double-buffered blocks plus in-kernel intermediates."""
    b = 2 * cin * x_itemsize                 # double-buffered x block
    b += 2 * n_outs * cout * out_itemsize    # double-buffered output block(s)
    b += cin * 6                             # f32 + bf16 working copies of x tile
    b += wa_rows * 4                         # first-dot f32 result (Cout or 2*Cout)
    b += cout * 14                           # h1(bf16) + out/res/act (f32)
    return b


def _candidate_tiles(extent, max_tile):
    """Multiples of 128 <= max_tile that divide `extent`, descending."""
    cands = []
    t = (min(max_tile, extent) // 128) * 128
    while t >= 128:
        if extent % t == 0:
            cands.append(t)
        t -= 128
    return cands


def _choose_tile(extent, outer_steps, max_tile, num_tc):
    """Pick a lane tile dividing `extent` (no jnp.pad copy); returns (tile, pad)."""
    if extent <= 128:
        return extent, False                  # single full block
    cands = _candidate_tiles(extent, max_tile)
    if not cands:
        # Nothing under the budget divides extent exactly: padded fallback.
        t = max(128, (min(max_tile, extent) // 128) * 128)
        return t, True
    if num_tc >= 2:
        def total_steps(t):
            return outer_steps * (extent // t)
        good = [t for t in cands
                if total_steps(t) % num_tc == 0 and total_steps(t) >= 2 * num_tc]
        ok = [t for t in cands if total_steps(t) % num_tc == 0]
        cands = good or ok or cands
    # On 1-TC chips simply take the largest tile that fits (fewest grid steps).
    return cands[0], False


# ----------------------------------------------------------------------------
# Kernel body.
# ----------------------------------------------------------------------------
def _tcn_block_kernel(x_ref, wa_ref, ba_ref, w2_ref, b2_ref, *out_refs,
                      identity_residual, return_pre_residual, matmul_dtype):
    """Fused pointwise TCN block on one (channels, lane-tile) slab.

    x_ref : (Cin, T)  streamed in its HBM dtype (bf16 preferred)
    wa_ref: (R, Cin)  R = Cout (identity residual) or 2*Cout (w1 stacked with wd)
    ba_ref: (R, 1) f32 stacked biases;  w2_ref: (Cout, Cout);  b2_ref: (Cout, 1)
    out_refs: optional pre-residual `out` (Cout, T), then `act` (Cout, T)
    """
    out_ref = out_refs[0] if return_pre_residual else None
    act_ref = out_refs[-1]

    x = x_ref[...]
    xm = x if x.dtype == matmul_dtype else x.astype(matmul_dtype)

    # conv1 (and, when present, the 1x1 downsample) as ONE stacked MXU matmul.
    h = jnp.dot(wa_ref[...], xm, preferred_element_type=jnp.float32) + ba_ref[...]
    if identity_residual:
        h1 = jnp.maximum(h, 0.0)
        res = x.astype(jnp.float32)           # downsample is None -> identity
    else:
        cout = w2_ref.shape[0]
        h1 = jnp.maximum(h[:cout], 0.0)
        res = h[cout:]                        # 1x1 downsample output (no ReLU)

    # conv2 + ReLU.  Dropout is identity in eval mode.
    h1m = h1 if h1.dtype == matmul_dtype else h1.astype(matmul_dtype)
    out = jnp.maximum(
        jnp.dot(w2_ref[...], h1m, preferred_element_type=jnp.float32) + b2_ref[...],
        0.0)

    if return_pre_residual:
        out_ref[...] = out.astype(out_ref.dtype)
    act_ref[...] = jnp.maximum(out + res, 0.0).astype(act_ref.dtype)


# ----------------------------------------------------------------------------
# Wrapper.
# ----------------------------------------------------------------------------
def temporal_block(x, params, *, kernel_size, stride, dilation, padding,
                   matmul_dtype=jnp.bfloat16, out_dtype=jnp.float32,
                   return_pre_residual=True, lane_block_bytes=None,
                   lane_dense_min_l=512):
    """TemporalBlock.forward: returns (out, relu(out + res)).

    return_pre_residual=False returns only relu(out + res) (halves HBM writes);
    out_dtype=jnp.bfloat16 halves writeback again when downstream accepts bf16.
    """
    w1, b1, w2, b2, wd, bd = params                 # PyTorch layouts
    N, cin, L = x.shape
    cout = w1.shape[0]

    # The only self-consistent configuration of the reference module:
    assert padding == 0, "reference Chomp1d slices channels -> only padding=0 runs"
    assert stride == 1 and kernel_size == 1, (
        "residual add out+res requires equal lengths -> kernel_size=1, stride=1")
    del dilation                                    # irrelevant when K == 1

    identity_residual = wd is None
    if identity_residual:
        assert cin == cout, "identity residual requires n_inputs == n_outputs"
        wa = w1[:, :, 0].astype(matmul_dtype)                        # (Cout, Cin)
        ba = b1.astype(jnp.float32)[:, None]                         # (Cout, 1)
    else:
        # Stack conv1 and the 1x1 downsample into one (2*Cout, Cin) matmul.
        wa = jnp.concatenate([w1[:, :, 0], wd[:, :, 0]], 0).astype(matmul_dtype)
        ba = jnp.concatenate([b1, bd], 0).astype(jnp.float32)[:, None]
    w2m = w2[:, :, 0].astype(matmul_dtype)                           # (Cout, Cout)
    b2c = b2.astype(jnp.float32)[:, None]
    wa_rows = wa.shape[0]

    vmem_cap, num_tc = _tpu_topology()
    if lane_block_bytes is None:
        lane_block_bytes = max(4 * 2**20, min(int(0.30 * vmem_cap), 40 * 2**20))

    mm_item = jnp.dtype(matmul_dtype).itemsize
    out_item = jnp.dtype(out_dtype).itemsize
    n_outs = 2 if return_pre_residual else 1

    weight_bytes = (wa_rows * cin + cout * cout) * mm_item + (wa_rows + cout) * 4
    wspec_kwargs = _invariant_weight_spec_kwargs(weight_bytes)
    weight_bufs = 1 if wspec_kwargs else 2
    fixed_bytes = weight_bufs * weight_bytes + 2 * 2**20     # + pipeline slack

    lane_dense = (L % 128 == 0) and (L >= lane_dense_min_l)
    x_item = jnp.dtype(x.dtype).itemsize if lane_dense else mm_item
    per_lane = _per_lane_bytes(cin, cout, wa_rows, n_outs, x_item, out_item)
    max_tile = max(128, int((lane_block_bytes - fixed_bytes) // per_lane))

    kernel = functools.partial(_tcn_block_kernel,
                               identity_residual=identity_residual,
                               return_pre_residual=return_pre_residual,
                               matmul_dtype=matmul_dtype)

    if lane_dense:
        # Native (N, Cin, L) layout: no transpose/reshape/pad passes over HBM.
        tile_L, _ = _choose_tile(L, N, max_tile, num_tc)
        steps_L = L // tile_L
        grid = (N, steps_L)
        const = lambda n, l: (0, 0)
        in_specs = [
            pl.BlockSpec((None, cin, tile_L), lambda n, l: (n, 0, l)),
            pl.BlockSpec((wa_rows, cin), const, **wspec_kwargs),
            pl.BlockSpec((wa_rows, 1), const),
            pl.BlockSpec((cout, cout), const, **wspec_kwargs),
            pl.BlockSpec((cout, 1), const),
        ]
        o_sds = jax.ShapeDtypeStruct((N, cout, L), out_dtype)
        o_spec = pl.BlockSpec((None, cout, tile_L), lambda n, l: (n, 0, l))
        dim_sem = ("parallel", "parallel")
        x_in = x
        tile_for_vmem = tile_L
    else:
        # Fold (N, L) into one lane-dense axis; stream x in matmul_dtype so the
        # kernel input DMA is half-width (bf16) and no per-tile VALU cast runs.
        total = N * L
        xf = jnp.transpose(x, (1, 0, 2)).reshape(cin, total).astype(matmul_dtype)
        tile, needs_pad = _choose_tile(total, 1, max_tile, num_tc)
        steps = int(pl.cdiv(total, tile))
        padded = steps * tile
        if needs_pad and padded != total:
            xf = jnp.pad(xf, ((0, 0), (0, padded - total)))   # rare fallback
        grid = (steps,)
        const = lambda i: (0, 0)
        in_specs = [
            pl.BlockSpec((cin, tile), lambda i: (0, i)),
            pl.BlockSpec((wa_rows, cin), const, **wspec_kwargs),
            pl.BlockSpec((wa_rows, 1), const),
            pl.BlockSpec((cout, cout), const, **wspec_kwargs),
            pl.BlockSpec((cout, 1), const),
        ]
        o_sds = jax.ShapeDtypeStruct((cout, padded), out_dtype)
        o_spec = pl.BlockSpec((cout, tile), lambda i: (0, i))
        dim_sem = ("parallel",)
        x_in = xf
        tile_for_vmem = tile

    # Scoped-VMEM budget: real working set with headroom, capped below physical.
    working_set = fixed_bytes + per_lane * tile_for_vmem
    vmem_limit = int(min(int(0.9 * vmem_cap),
                         max(8 * 2**20, int(1.5 * working_set))))

    total_lanes = N * L
    cost = pl.CostEstimate(
        flops=int(2 * total_lanes * (wa_rows * cin + cout * cout)),
        transcendentals=0,
        bytes_accessed=int(total_lanes * cin * jnp.dtype(x_in.dtype).itemsize
                           + weight_bytes
                           + n_outs * total_lanes * cout * out_item))

    out_shape = (o_sds, o_sds) if return_pre_residual else o_sds
    out_specs = (o_spec, o_spec) if return_pre_residual else o_spec

    result = pl.pallas_call(
        kernel,
        out_shape=out_shape,
        grid_spec=pltpu.PrefetchScalarGridSpec(
            num_scalar_prefetch=0,
            grid=grid,
            in_specs=in_specs,
            out_specs=out_specs),
        compiler_params=pltpu.CompilerParams(
            dimension_semantics=dim_sem,
            vmem_limit_bytes=vmem_limit),
        cost_estimate=cost,
    )(x_in, wa, ba, w2m, b2c)

    def _postprocess(y):
        if lane_dense:
            return y                                  # already (N, Cout, L)
        if y.shape[1] != N * L:
            y = y[:, :N * L]
        return jnp.transpose(y.reshape(cout, N, L), (1, 0, 2))

    if return_pre_residual:
        out_flat, act_flat = result
        return _postprocess(out_flat), _postprocess(act_flat)
    return _postprocess(result)


# ----------------------------------------------------------------------------
# Parameters / reference.
# ----------------------------------------------------------------------------
def _weight_norm(v):
    """PyTorch weight_norm (dim=0): w = g * v / ||v||, g initialized to ||v||."""
    norm = jnp.sqrt(jnp.sum(v * v, axis=(1, 2), keepdims=True))
    g = norm
    return g * v / norm


def init_params(key, n_inputs, n_outputs, kernel_size):
    """Deterministic synthetic parameters (PyTorch layouts from TemporalBlock)."""
    k1, k2, k3, k4, k5, k6 = jax.random.split(key, 6)
    v1 = 0.5 * jax.random.normal(k1, (n_outputs, n_inputs, kernel_size), jnp.float32)
    v2 = 0.5 * jax.random.normal(k2, (n_outputs, n_outputs, kernel_size), jnp.float32)
    w1, w2 = _weight_norm(v1), _weight_norm(v2)
    b1 = 0.1 * jax.random.normal(k3, (n_outputs,), jnp.float32)
    b2 = 0.1 * jax.random.normal(k4, (n_outputs,), jnp.float32)
    if n_inputs != n_outputs:
        wd = 0.5 * jax.random.normal(k5, (n_outputs, n_inputs, 1), jnp.float32)
        bd = 0.1 * jax.random.normal(k6, (n_outputs,), jnp.float32)
    else:                     # downsample is None -> identity residual
        wd, bd = None, None
    return (w1, b1, w2, b2, wd, bd)


def _reference_forward(x, params, matmul_dtype=jnp.float32, x_stream_dtype=None):
    """Pure-JAX reference for the kernel_size=1 configuration.

    x_stream_dtype mirrors the dtype in which the kernel streams x (the folded
    path streams x in matmul_dtype, the lane-dense path streams it natively).
    """
    w1, b1, w2, b2, wd, bd = params
    xs = x if x_stream_dtype is None else x.astype(x_stream_dtype)

    def mm(w, a):             # (Cout,Cin_,1) x (N,Cin_,L) -> (N,Cout,L), f32 acc
        return jnp.einsum("oik,nil->nol",
                          w.astype(matmul_dtype), a.astype(matmul_dtype),
                          precision=jax.lax.Precision.HIGHEST,
                          preferred_element_type=jnp.float32)

    h1 = jnp.maximum(mm(w1, xs) + b1[None, :, None], 0.0)
    out = jnp.maximum(mm(w2, h1) + b2[None, :, None], 0.0)
    res = xs.astype(jnp.float32) if wd is None else mm(wd, xs) + bd[None, :, None]
    return out, jnp.maximum(out + res, 0.0)


if __name__ == "__main__":
    kernel_size, stride, dilation, padding = 1, 1, 1, 0
    key = jax.random.PRNGKey(0)

    configs = [
        # L=128 -> folded-lane path; L=512 -> lane-dense native path.
        dict(N=2, n_in=4, n_out=8, L=128),    # fold path, 1x1-downsample residual
        dict(N=2, n_in=8, n_out=8, L=128),    # fold path, identity residual
        dict(N=2, n_in=8, n_out=8, L=512),    # lane-dense path, identity residual
    ]

    for cfg in configs:
        key, kx, kp = jax.random.split(key, 3)
        x = jax.random.normal(kx, (cfg["N"], cfg["n_in"], cfg["L"]), jnp.float32)
        params = init_params(kp, cfg["n_in"], cfg["n_out"], kernel_size)

        # ---- f32 matmul mode: structural check (layout/indexing).  Loose
        # tolerance because in-kernel "f32" MXU dots may be lowered to
        # multi-pass bf16; real bugs produce O(1) errors, far above this.
        ref_out, ref_act = _reference_forward(x, params, jnp.float32)
        out, act = temporal_block(x, params, kernel_size=kernel_size,
                                  stride=stride, dilation=dilation,
                                  padding=padding, matmul_dtype=jnp.float32)
        jax.block_until_ready((out, act))
        assert jnp.allclose(out, ref_out, rtol=5e-2, atol=5e-2), cfg
        assert jnp.allclose(act, ref_act, rtol=5e-2, atol=5e-2), cfg

        # ---- bf16 matmul inputs / f32 accumulation vs a dtype-matched
        # reference: the tight numerical check (same bf16 roundings both sides).
        x_stream = jnp.bfloat16 if cfg["L"] < 512 else None   # fold path streams bf16
        ref_out_bf, ref_act_bf = _reference_forward(x, params, jnp.bfloat16,
                                                    x_stream_dtype=x_stream)
        out_bf, act_bf = temporal_block(x, params, kernel_size=kernel_size,
                                        stride=stride, dilation=dilation,
                                        padding=padding,
                                        matmul_dtype=jnp.bfloat16)
        jax.block_until_ready((out_bf, act_bf))
        assert jnp.allclose(out_bf, ref_out_bf, rtol=1e-2, atol=1e-2), cfg
        assert jnp.allclose(act_bf, ref_act_bf, rtol=1e-2, atol=1e-2), cfg

    # Act-only variant (halves HBM writeback when `out` isn't consumed).
    act_only = temporal_block(x, params, kernel_size=kernel_size, stride=stride,
                              dilation=dilation, padding=padding,
                              matmul_dtype=jnp.float32,
                              return_pre_residual=False)
    jax.block_until_ready(act_only)
    assert jnp.allclose(act_only, ref_act, rtol=5e-2, atol=5e-2)

    print("KERNEL_OK")
</pallas_src>

<mosaic_0001>
module attributes {stable_mosaic.version = 11 : i64} {
  func.func @_tcn_block_kernel(%arg0: i32, %arg1: memref<4x256xf32, #tpu.memory_space<vmem>>, %arg2: memref<16x4xf32, #tpu.memory_space<vmem>>, %arg3: memref<16x1xf32, #tpu.memory_space<vmem>>, %arg4: memref<8x8xf32, #tpu.memory_space<vmem>>, %arg5: memref<8x1xf32, #tpu.memory_space<vmem>>, %arg6: memref<8x256xf32, #tpu.memory_space<vmem>>, %arg7: memref<8x256xf32, #tpu.memory_space<vmem>>) attributes {dimension_semantics = [#tpu.dimension_semantics<parallel>], iteration_bounds = array<i64: 1>, scalar_prefetch = 0 : i64, scratch_operands = 0 : i64, tpu.core_type = #tpu.core_type<tc>, window_params = [{transform_indices = @transform_0, window_bounds = array<i64: 4, 256>}, {pipeline_mode = #tpu.pipeline_mode<synchronous>, transform_indices = @transform_1, window_bounds = array<i64: 16, 4>}, {pipeline_mode = #tpu.pipeline_mode<synchronous>, transform_indices = @transform_2, window_bounds = array<i64: 16, 1>}, {pipeline_mode = #tpu.pipeline_mode<synchronous>, transform_indices = @transform_3, window_bounds = array<i64: 8, 8>}, {pipeline_mode = #tpu.pipeline_mode<synchronous>, transform_indices = @transform_4, window_bounds = array<i64: 8, 1>}, {transform_indices = @transform_5, window_bounds = array<i64: 8, 256>}, {transform_indices = @transform_6, window_bounds = array<i64: 8, 256>}]} {
    %c0 = arith.constant 0 : index
    %c0_0 = arith.constant 0 : index
    %0 = vector.load %arg1[%c0, %c0_0] : memref<4x256xf32, #tpu.memory_space<vmem>>, vector<4x256xf32>
    %c0_1 = arith.constant 0 : index
    %c0_2 = arith.constant 0 : index
    %1 = vector.load %arg2[%c0_1, %c0_2] : memref<16x4xf32, #tpu.memory_space<vmem>>, vector<16x4xf32>
    %cst = arith.constant dense<0.000000e+00> : vector<16x256xf32>
    %2 = tpu.matmul %1, %0, %cst {dimension_numbers = #tpu.dot_dimension_numbers<[1], [0], [0], [1], [0, 0, 1, 1], [], []>} : vector<16x4xf32>, vector<4x256xf32>, vector<16x256xf32> -> vector<16x256xf32>
    %c0_3 = arith.constant 0 : index
    %c0_4 = arith.constant 0 : index
    %3 = vector.load %arg3[%c0_3, %c0_4] : memref<16x1xf32, #tpu.memory_space<vmem>>, vector<16x1xf32>
    %4 = vector.broadcast %3 : vector<16x1xf32> to vector<16x256xf32>
    %5 = arith.addf %2, %4 : vector<16x256xf32>
    %6 = vector.extract_strided_slice %5 {offsets = [0, 0], sizes = [8, 256], strides = [1, 1]} : vector<16x256xf32> to vector<8x256xf32>
    %cst_5 = arith.constant 0.000000e+00 : f32
    %7 = vector.broadcast %cst_5 : f32 to vector<8x256xf32>
    %8 = arith.maximumf %6, %7 : vector<8x256xf32>
    %9 = vector.extract_strided_slice %5 {offsets = [8, 0], sizes = [8, 256], strides = [1, 1]} : vector<16x256xf32> to vector<8x256xf32>
    %c0_6 = arith.constant 0 : index
    %c0_7 = arith.constant 0 : index
    %10 = vector.load %arg4[%c0_6, %c0_7] : memref<8x8xf32, #tpu.memory_space<vmem>>, vector<8x8xf32>
    %cst_8 = arith.constant dense<0.000000e+00> : vector<8x256xf32>
    %11 = tpu.matmul %10, %8, %cst_8 {dimension_numbers = #tpu.dot_dimension_numbers<[1], [0], [0], [1], [0, 0, 1, 1], [], []>} : vector<8x8xf32>, vector<8x256xf32>, vector<8x256xf32> -> vector<8x256xf32>
    %c0_9 = arith.constant 0 : index
    %c0_10 = arith.constant 0 : index
    %12 = vector.load %arg5[%c0_9, %c0_10] : memref<8x1xf32, #tpu.memory_space<vmem>>, vector<8x1xf32>
    %13 = vector.broadcast %12 : vector<8x1xf32> to vector<8x256xf32>
    %14 = arith.addf %11, %13 : vector<8x256xf32>
    %cst_11 = arith.constant 0.000000e+00 : f32
    %15 = vector.broadcast %cst_11 : f32 to vector<8x256xf32>
    %16 = arith.maximumf %14, %15 : vector<8x256xf32>
    %c0_12 = arith.constant 0 : index
    %c0_13 = arith.constant 0 : index
    %17 = vector.load %arg6[%c0_12, %c0_13] : memref<8x256xf32, #tpu.memory_space<vmem>>, vector<8x256xf32>
    tpu.vector_store %arg6[%c0_12, %c0_13], %16 {strides = array<i32>} : memref<8x256xf32, #tpu.memory_space<vmem>>, vector<8x256xf32>,
    %18 = arith.addf %16, %9 : vector<8x256xf32>
    %cst_14 = arith.constant 0.000000e+00 : f32
    %19 = vector.broadcast %cst_14 : f32 to vector<8x256xf32>
    %20 = arith.maximumf %18, %19 : vector<8x256xf32>
    %c0_15 = arith.constant 0 : index
    %c0_16 = arith.constant 0 : index
    %21 = vector.load %arg7[%c0_15, %c0_16] : memref<8x256xf32, #tpu.memory_space<vmem>>, vector<8x256xf32>
    tpu.vector_store %arg7[%c0_15, %c0_16], %20 {strides = array<i32>} : memref<8x256xf32, #tpu.memory_space<vmem>>, vector<8x256xf32>,
    return
  }
  func.func @transform_0(%arg0: i32) -> (i32, i32) {
    %c0_i32 = arith.constant 0 : i32
    %c0_i32_0 = arith.constant 0 : i32
    return %c0_i32, %arg0 : i32, i32
  }
  func.func @transform_1(%arg0: i32) -> (i32, i32) {
    %c0_i32 = arith.constant 0 : i32
    %c0_i32_0 = arith.constant 0 : i32
    %c0_i32_1 = arith.constant 0 : i32
    return %c0_i32, %c0_i32_0 : i32, i32
  }
  func.func @transform_2(%arg0: i32) -> (i32, i32) {
    %c0_i32 = arith.constant 0 : i32
    %c0_i32_0 = arith.constant 0 : i32
    %c0_i32_1 = arith.constant 0 : i32
    return %c0_i32, %c0_i32_0 : i32, i32
  }
  func.func @transform_3(%arg0: i32) -> (i32, i32) {
    %c0_i32 = arith.constant 0 : i32
    %c0_i32_0 = arith.constant 0 : i32
    %c0_i32_1 = arith.constant 0 : i32
    return %c0_i32, %c0_i32_0 : i32, i32
  }
  func.func @transform_4(%arg0: i32) -> (i32, i32) {
    %c0_i32 = arith.constant 0 : i32
    %c0_i32_0 = arith.constant 0 : i32
    %c0_i32_1 = arith.constant 0 : i32
    return %c0_i32, %c0_i32_0 : i32, i32
  }
  func.func @transform_5(%arg0: i32) -> (i32, i32) {
    %c0_i32 = arith.constant 0 : i32
    %c0_i32_0 = arith.constant 0 : i32
    return %c0_i32, %arg0 : i32, i32
  }
  func.func @transform_6(%arg0: i32) -> (i32, i32) {
    %c0_i32 = arith.constant 0 : i32
    %c0_i32_0 = arith.constant 0 : i32
    return %c0_i32, %arg0 : i32, i32
  }
}

</mosaic_0001>

<bundles_post_ra>
// kernel: tpu_custom_call.1
= control target key start
LH: loop header
LB: loop body
LE: loop exit
PB: predicated region body
PF: predicated region fallthrough
CT: control target
= control target key end

     0   :  { %12 = vsyncpa [#allocation3], 0  ;;  %v261_v2 = vmov 0   ;;  %s326_s0 = inlined_call_operand.vmem [shape: f32[4,256], index: 0, kind: input, shape index: {}]   ;;  %s327_s1 = inlined_call_operand.vmem [shape: f32[16,4], index: 1, kind: input, shape index: {}]   ;;  %s328_s2 = inlined_call_operand.vmem [shape: f32[16,1], index: 2, kind: input, shape index: {}]   ;;  %s329_s3 = inlined_call_operand.vmem [shape: f32[8,8], index: 3, kind: input, shape index: {}]   ;;  %s330_s4 = inlined_call_operand.vmem [shape: f32[8,1], index: 4, kind: input, shape index: {}]   ;;  %s331_s5 = inlined_call_operand.hbm [shape: f32[8,256], index: 5, kind: output, shape index: {0}]   ;;  %s332_s6 = inlined_call_operand.hbm [shape: f32[8,256], index: 6, kind: output, shape index: {1}]  }
   0x1   :  { %v24_v0 = vld [vmem:[%s326_s0] sm:$0xff]  ;;  %207 = vset.pattern.permute.xlu0 %v261_v2  ;;  %208 = vset.pattern.permute.xlu1 %v261_v2 }
   0x2   :  { %v27_v1 = vld [vmem:[%s328_s2] sm:$0xff]  ;;  %40 = vst [vmem:[#allocation1] ss:$2 sm:$0xff] %v24_v0 }
   0x3   :  { %13 = vsyncpa [#allocation5], 0  ;;  %31 = vperm.xlu0 %207, %v27_v1   ;;  %vm50_vm0 = vcmask 1043456   ;;  %v25_v3 = vld [vmem:[%s327_s1] sm:$0xff]  ;;  %vm43_vm1 = vcmask 31744   ;;  %v26_v7 = vld [vmem:[%s327_s1 + $0x8] sm:$0xff] }
   0x4   :  { %v104_v4 = vld [vmem:[%s330_s4] sm:$0xff]  ;;  %v28_v8 = vld [vmem:[%s328_s2 + $0x8] sm:$0xff]  ;;  %vm110_vm2 = vcmask 64512   ;;  %s262_s1 = smov [#allocation2]   ;;  %s263_s11 = smov [#allocation4]  }
   0x5   :  { %36 = vperm.xlu1 %208, %v28_v8   ;;  %v103_v16 = vld [vmem:[%s329_s3] sm:$0xff]  ;;  %s169_s2 = sshll.u32 %s262_s1, 4  ;;  %s171_s3 = sshll.u32 %s331_s5, 4  ;;  %s170_s2 = int_to_ptr.vmem [resolvable:$true] %s169_s2  ;;  %s172_s3 = int_to_ptr.hbm [resolvable:$true] %s171_s3 }
   0x6   :  { %s180_s12 = sshll.u32 %s263_s11, 4  ;;  %s182_s15 = sshll.u32 %s332_s6, 4  ;;  %s181_s12 = int_to_ptr.vmem [resolvable:$true] %s180_s12  ;;  %s183_s15 = int_to_ptr.hbm [resolvable:$true] %s182_s15 }
   0x9   :  { %v41_v5 = vld.sshfl [vmem:[#allocation1] sm:$0xff pattern:$0x75316420]  ;;  %v42_v6 = vld.sshfl [vmem:[#allocation1 + $0x8] sm:$0xff pattern:$0x75316420] }
   0xa   :  { %196 = vmatpush.msk.msra.mxu0 %vm50_vm0, %v41_v5  ;;  %199 = vmatpush.msk.msra.mxu1 %vm50_vm0, %v42_v6 }
   0xb   :  { %197 = vmatmul.msk.f32.vlgmr.msra.gmra.mxu0 %vm43_vm1, %v25_v3  ;;  %200 = vmatmul.msk.f32.vlgmr.msra.gmra.mxu1 %vm43_vm1, %v25_v3 }
   0xc   :  { %107 = vperm.xlu0 %207, %v104_v4  }
  0x13   :  { %198 = vmatmul.msk.f32.gmra.mxu0 %vm43_vm1, %v26_v7  ;;  %201 = vmatmul.msk.f32.gmra.mxu1 %vm43_vm1, %v26_v7 }
  0x75   :  { %v32_v9 = vpop.permute.xlu0 %31 }
  0x77   :  { %v37_v17 = vpop.permute.xlu1 %36 }
  0x7e   :  { %v108_v20 = vpop.permute.xlu0 %107 }
  0x88   :  { %v72_v10 = vpop.f32.mrf.mxu0  ;;  %v95_v11 = vpop.f32.mrf.mxu1 }
  0x89   :  { %v73_v12 = vadd.f32 %v72_v10, %v32_v9  ;;  %v96_v13 = vadd.f32 %v95_v11, %v32_v9 }
  0x8b   :  { %v101_v14 = vmax.f32 %v73_v12, 0.0  ;;  %v102_v15 = vmax.f32 %v96_v13, 0.0 }
  0x8d   :  { %129 = vmatpush.msra.mxu2 %v101_v14  ;;  %149 = vmatpush.msra.mxu3 %v102_v15 }
  0x8e   :  { %202 = vmatmul.msk.f32.vlgmr.msra.gmra.mxu2 %vm110_vm2, %v103_v16  ;;  %203 = vmatmul.msk.f32.vlgmr.msra.gmra.mxu3 %vm110_vm2, %v103_v16 }
  0x90   :  { %v75_v18 = vpop.f32.mrf.mxu0  ;;  %v98_v19 = vpop.f32.mrf.mxu1 }
  0x91   :  { %v76_v25 = vadd.f32 %v75_v18, %v37_v17  ;;  %v99_v26 = vadd.f32 %v98_v19, %v37_v17 }
 0x111   :  { %v131_v21 = vpop.f32.mrf.mxu2  ;;  %v151_v22 = vpop.f32.mrf.mxu3 }
 0x112   :  { %v132_v23 = vadd.f32 %v131_v21, %v108_v20  ;;  %v152_v24 = vadd.f32 %v151_v22, %v108_v20 }
 0x114   :  { %v154_v27 = vmax.f32 %v132_v23, 0.0  ;;  %v155_v28 = vmax.f32 %v152_v24, 0.0 }
 0x116   :  { %156 = vst [vmem:[#allocation2] sm:$0xff] %v154_v27  ;;  %v158_v29 = vadd.f32 %v154_v27, %v76_v25  ;;  %v159_v30 = vadd.f32 %v155_v28, %v99_v26 }
 0x117   :  { %157 = vst [vmem:[#allocation2 + $0x8] sm:$0xff] %v155_v28 }
 0x118   :  { %v160_v31 = vmax.f32 %v158_v29, 0.0  ;;  %v161_v32 = vmax.f32 %v159_v30, 0.0  ;;  %174 = dma.vmem_to_hbm [thread:$0]  %s170_s2, 256, %s172_s3, [#allocation3]  }
 0x11a   :  { %162 = vst [vmem:[#allocation4] sm:$0xff] %v160_v31 }
 0x11b   :  { %163 = vst [vmem:[#allocation4 + $0x8] sm:$0xff] %v161_v32 }
 0x11c   :  { %185 = dma.vmem_to_hbm [thread:$0]  %s181_s12, 256, %s183_s15, [#allocation5]  }
 0x11d   :  { %257 = dma.done.wait [#allocation3], 256  }
 0x11e   :  { %258 = vsyncadd [#allocation3], 4294967040 }
 0x11f   :  { %259 = dma.done.wait [#allocation5], 256  }
 0x120   :  { %260 = vsyncadd [#allocation5], 4294967040 }
 0x121   :  { %194 = vsyncpa [#allocation3], 1 }
 0x122   :  { %195 = vsyncpa [#allocation5], 1 }

</bundles_post_ra>
